<compile_context>
chip_gen: v5e
topology: v5e:2x2
jax: 0.10.0
libtpu: 0.0.40
codegen_flags: <defaults>
</compile_context>

<pallas_src>
import functools

import numpy as np
import jax
import jax.numpy as jnp
from jax import lax
from jax.experimental import pallas as pl
from jax.experimental.pallas import tpu as pltpu


def _reparam_kernel(x_ref, w_ref, m_ref, b_ref, o_ref, *, width):
    """Fused (3x3 + 1x1 + identity, BN-folded) conv for a block of images.

    x_ref: (B, Cin, M)      input images, row-flattened (M = H*W), native dtype
    w_ref: (Cout, 9*Cin)    fused weight, flat index = dx*3*Cin + dy*Cin + ci
    m_ref: (4, M)  f32      0/1 masks: [row!=0, row!=H-1, col!=0, col!=W-1]
    b_ref: (Cout, 1) f32    fused bias (sum of the three BN shifts)
    o_ref: (B, Cout, M)     output (lane-dense pixel dim), bf16 by default
    """
    bsz, _, m = x_ref.shape
    masks = m_ref[...]                       # (4, M) f32 — loaded once per step
    m_top = masks[0:1, :]                    # valid where output row    != 0
    m_bot = masks[1:2, :]                    # valid where output row    != H-1
    m_lft = masks[2:3, :]                    # valid where output column != 0
    m_rgt = masks[3:4, :]                    # valid where output column != W-1
    w = w_ref[...]                           # (Cout, 9*Cin) f32
    bias = b_ref[...]                        # (Cout, 1)     f32

    for bi in range(bsz):
        x = x_ref[bi].astype(jnp.float32)                       # (Cin, M)
        # Row (H-direction) halo: shift whole rows with an XLU roll, then zero
        # the wrapped first/last output rows.  roll(x, s)[p] == x[p - s].
        top = pltpu.roll(x, width, axis=1) * m_top               # dy = 0 taps
        bot = pltpu.roll(x, m - width, axis=1) * m_bot           # dy = 2 taps
        mid3 = jnp.concatenate([top, x, bot], axis=0)            # (3*Cin, M), dx = 1
        # Column (W-direction) halo: +/-1 lane rolls of the whole 3*Cin stack,
        # masked once each (mask is per-pixel, so it commutes with the dot).
        lft3 = pltpu.roll(mid3, 1, axis=1) * m_lft               # dx = 0 taps
        rgt3 = pltpu.roll(mid3, m - 1, axis=1) * m_rgt           # dx = 2 taps
        slab = jnp.concatenate([lft3, mid3, rgt3], axis=0)       # (9*Cin, M)
        # Single fused matmul, K = 9*Cin, f32 accumulation.
        acc = jnp.dot(w, slab, preferred_element_type=jnp.float32) + bias
        o_ref[bi] = acc.astype(o_ref.dtype)


def _bn_fold(gamma, beta, mean, var, eps):
    """Eval-mode BN(y) = s*y + t, per channel."""
    s = gamma / jnp.sqrt(var + eps)
    t = beta - mean * s
    return s, t


def _pick_batch_block(n, img_bytes, target=512 * 1024,
                      max_bytes=8 * 1024 * 1024, min_steps=4):
    """Images per grid step: aim for >= ~512 KB per step, keep >= min_steps steps."""
    best = 1
    for b in range(1, n + 1):
        if n % b:
            continue
        if b > 1 and (b * img_bytes > max_bytes or n // b < min_steps):
            break
        best = b
        if b * img_bytes >= target:
            break
    return best


def reparam_conv_block(x_nchw, params, *, out_dtype=jnp.bfloat16, eps=1e-5,
                       batch_block=None):
    """Forward of ReparamConvBlock (non-deploy, eval-mode BN). NCHW in / out."""
    w3, bn3, w1, bn1, bnid = params
    cout, cin = w3.shape[0], w3.shape[1]
    n, _, h, w = x_nchw.shape
    m = h * w

    # ---- host glue: exact RepVGG reparameterization (fold all branches) ----
    s3, t3 = _bn_fold(*bn3, eps)
    s1, t1 = _bn_fold(*bn1, eps)
    w_eq = w3 * s3[:, None, None, None]                         # (Cout, Cin, 3, 3)
    w_eq = w_eq.at[:, :, 1, 1].add((w1 * s1[:, None, None, None])[:, :, 0, 0])
    bias = t3 + t1
    if bnid is not None and cin == cout:
        sid, tid = _bn_fold(*bnid, eps)
        w_eq = w_eq.at[:, :, 1, 1].add(jnp.diag(sid))           # identity branch
        bias = bias + tid
    # Kernel weight layout (Cout, 9*Cin): flat index = dx*3*Cin + dy*Cin + ci,
    # matching the in-kernel slab order.  Kept in f32 (precision of the
    # identity-folded center tap).
    w_k = jnp.transpose(w_eq, (0, 3, 2, 1)).reshape(cout, 9 * cin)
    w_k = w_k.astype(jnp.float32)
    b_k = bias[:, None].astype(jnp.float32)                     # (Cout, 1)

    # ---- halo masks (f32: keeps elementwise work off v5e's int/f32-only VPU) ----
    rows = np.arange(m) // w
    cols = np.arange(m) % w
    masks = jnp.asarray(np.stack([rows != 0, rows != h - 1,
                                  cols != 0, cols != w - 1]).astype(np.float32))

    # ---- input: metadata-only reshape, NO pad / cast pre-pass ----
    x_flat = x_nchw.reshape(n, cin, m)

    # ---- per-grid-step batch blocking ----
    img_bytes = cin * m * x_flat.dtype.itemsize + cout * m * jnp.dtype(out_dtype).itemsize
    b_tile = batch_block if batch_block is not None else _pick_batch_block(n, img_bytes)
    assert n % b_tile == 0, "batch_block must divide the batch size"

    flops = 2 * n * m * 9 * cin * cout
    bytes_accessed = (n * cin * m * x_flat.dtype.itemsize
                      + w_k.size * 4 + masks.size * 4 + b_k.size * 4
                      + n * cout * m * jnp.dtype(out_dtype).itemsize)

    out_flat = pl.pallas_call(
        functools.partial(_reparam_kernel, width=w),
        out_shape=jax.ShapeDtypeStruct((n, cout, m), out_dtype),
        grid=(n // b_tile,),
        in_specs=[
            pl.BlockSpec((b_tile, cin, m), lambda i: (i, 0, 0)),
            pl.BlockSpec((cout, 9 * cin), lambda i: (0, 0)),
            pl.BlockSpec((4, m), lambda i: (0, 0)),
            pl.BlockSpec((cout, 1), lambda i: (0, 0)),
        ],
        out_specs=pl.BlockSpec((b_tile, cout, m), lambda i: (i, 0, 0)),
        compiler_params=pltpu.CompilerParams(
            dimension_semantics=("parallel",),          # shard steps on v7x's 2 TCs
            vmem_limit_bytes=48 * 1024 * 1024,          # safe on v7x's 64 MiB VMEM
        ),
        cost_estimate=pl.CostEstimate(
            flops=flops, transcendentals=0, bytes_accessed=bytes_accessed),
    )(x_flat, w_k, masks, b_k)

    return out_flat.reshape(n, cout, h, w)


def _reference(x_nchw, params, eps=1e-5):
    """Pure-JAX reference of the same forward (NCHW convs + eval-mode BN)."""
    w3, bn3, w1, bn1, bnid = params
    dn = lax.conv_dimension_numbers(x_nchw.shape, w3.shape, ("NCHW", "OIHW", "NCHW"))

    def bn(y, p):
        s, t = _bn_fold(*p, eps)
        return y * s[None, :, None, None] + t[None, :, None, None]

    y3 = lax.conv_general_dilated(x_nchw, w3, (1, 1), ((1, 1), (1, 1)),
                                  dimension_numbers=dn)
    y1 = lax.conv_general_dilated(x_nchw, w1, (1, 1), ((0, 0), (0, 0)),
                                  dimension_numbers=dn)
    out = bn(y3, bn3) + bn(y1, bn1)
    if bnid is not None:
        out = out + bn(x_nchw, bnid)
    return out


def _init_params(key, cin, cout):
    ks = jax.random.split(key, 5)
    w3 = 0.1 * jax.random.normal(ks[0], (cout, cin, 3, 3), jnp.float32)
    w1 = 0.1 * jax.random.normal(ks[1], (cout, cin, 1, 1), jnp.float32)

    def bn_params(k, c):
        k0, k1, k2, k3 = jax.random.split(k, 4)
        gamma = 1.0 + 0.1 * jax.random.normal(k0, (c,), jnp.float32)
        beta = 0.1 * jax.random.normal(k1, (c,), jnp.float32)
        mean = 0.1 * jax.random.normal(k2, (c,), jnp.float32)
        var = jax.random.uniform(k3, (c,), jnp.float32, 0.5, 1.5)
        return (gamma, beta, mean, var)

    bn3 = bn_params(ks[2], cout)
    bn1 = bn_params(ks[3], cout)
    bnid = bn_params(ks[4], cin)   # identity branch exists: cin == cout, stride=1
    return (w3, bn3, w1, bn1, bnid)


if __name__ == "__main__":
    key = jax.random.PRNGKey(0)
    kx, kp = jax.random.split(key)

    N, C, H, W = 2, 4, 16, 16            # in_channels == out_channels, stride=1
    x = jax.random.normal(kx, (N, C, H, W), jnp.float32)
    params = _init_params(kp, C, C)

    out = jax.jit(reparam_conv_block)(x, params)
    out = jax.block_until_ready(out)

    ref = jax.block_until_ready(_reference(x, params))
    assert out.shape == (N, C, H, W)
    # f32 weights + f32 accumulation; only the final store is bf16.
    np.testing.assert_allclose(np.asarray(out.astype(jnp.float32)), np.asarray(ref),
                               rtol=2e-2, atol=2e-2)

    print("KERNEL_OK")
</pallas_src>

<mosaic_0001>
module attributes {stable_mosaic.version = 11 : i64} {
  func.func @_reparam_kernel(%arg0: i32, %arg1: memref<1x4x256xf32, #tpu.memory_space<vmem>>, %arg2: memref<4x36xf32, #tpu.memory_space<vmem>>, %arg3: memref<4x256xf32, #tpu.memory_space<vmem>>, %arg4: memref<4x1xf32, #tpu.memory_space<vmem>>, %arg5: memref<1x4x256xbf16, #tpu.memory_space<vmem>>) attributes {dimension_semantics = [#tpu.dimension_semantics<parallel>], iteration_bounds = array<i64: 2>, scalar_prefetch = 0 : i64, scratch_operands = 0 : i64, tpu.core_type = #tpu.core_type<tc>, window_params = [{transform_indices = @transform_0, window_bounds = array<i64: 1, 4, 256>}, {pipeline_mode = #tpu.pipeline_mode<synchronous>, transform_indices = @transform_1, window_bounds = array<i64: 4, 36>}, {pipeline_mode = #tpu.pipeline_mode<synchronous>, transform_indices = @transform_2, window_bounds = array<i64: 4, 256>}, {pipeline_mode = #tpu.pipeline_mode<synchronous>, transform_indices = @transform_3, window_bounds = array<i64: 4, 1>}, {transform_indices = @transform_4, window_bounds = array<i64: 1, 4, 256>}]} {
    %c0 = arith.constant 0 : index
    %c0_0 = arith.constant 0 : index
    %0 = vector.load %arg3[%c0, %c0_0] : memref<4x256xf32, #tpu.memory_space<vmem>>, vector<4x256xf32>
    %1 = vector.extract_strided_slice %0 {offsets = [0, 0], sizes = [1, 256], strides = [1, 1]} : vector<4x256xf32> to vector<1x256xf32>
    %2 = vector.extract_strided_slice %0 {offsets = [1, 0], sizes = [1, 256], strides = [1, 1]} : vector<4x256xf32> to vector<1x256xf32>
    %3 = vector.extract_strided_slice %0 {offsets = [2, 0], sizes = [1, 256], strides = [1, 1]} : vector<4x256xf32> to vector<1x256xf32>
    %4 = vector.extract_strided_slice %0 {offsets = [3, 0], sizes = [1, 256], strides = [1, 1]} : vector<4x256xf32> to vector<1x256xf32>
    %c0_1 = arith.constant 0 : index
    %c0_2 = arith.constant 0 : index
    %5 = vector.load %arg2[%c0_1, %c0_2] : memref<4x36xf32, #tpu.memory_space<vmem>>, vector<4x36xf32>
    %c0_3 = arith.constant 0 : index
    %c0_4 = arith.constant 0 : index
    %6 = vector.load %arg4[%c0_3, %c0_4] : memref<4x1xf32, #tpu.memory_space<vmem>>, vector<4x1xf32>
    %c0_5 = arith.constant 0 : index
    %c0_6 = arith.constant 0 : index
    %c0_7 = arith.constant 0 : index
    %7 = vector.load %arg1[%c0_5, %c0_6, %c0_7] : memref<1x4x256xf32, #tpu.memory_space<vmem>>, vector<1x4x256xf32>
    %8 = vector.shape_cast %7 : vector<1x4x256xf32> to vector<4x256xf32>
    %c16_i32 = arith.constant 16 : i32
    %9 = tpu.dynamic_rotate %8 by %c16_i32 dim 1 : vector<4x256xf32>, i32 -> vector<4x256xf32>
    %10 = vector.broadcast %1 : vector<1x256xf32> to vector<4x256xf32>
    %11 = arith.mulf %9, %10 : vector<4x256xf32>
    %c240_i32 = arith.constant 240 : i32
    %12 = tpu.dynamic_rotate %8 by %c240_i32 dim 1 : vector<4x256xf32>, i32 -> vector<4x256xf32>
    %13 = vector.broadcast %2 : vector<1x256xf32> to vector<4x256xf32>
    %14 = arith.mulf %12, %13 : vector<4x256xf32>
    %15 = tpu.concatenate %11, %8, %14 in 0 : vector<4x256xf32>, vector<4x256xf32>, vector<4x256xf32> -> vector<12x256xf32>
    %c1_i32 = arith.constant 1 : i32
    %16 = tpu.dynamic_rotate %15 by %c1_i32 dim 1 : vector<12x256xf32>, i32 -> vector<12x256xf32>
    %17 = vector.broadcast %3 : vector<1x256xf32> to vector<12x256xf32>
    %18 = arith.mulf %16, %17 : vector<12x256xf32>
    %c255_i32 = arith.constant 255 : i32
    %19 = tpu.dynamic_rotate %15 by %c255_i32 dim 1 : vector<12x256xf32>, i32 -> vector<12x256xf32>
    %20 = vector.broadcast %4 : vector<1x256xf32> to vector<12x256xf32>
    %21 = arith.mulf %19, %20 : vector<12x256xf32>
    %22 = tpu.concatenate %18, %15, %21 in 0 : vector<12x256xf32>, vector<12x256xf32>, vector<12x256xf32> -> vector<36x256xf32>
    %cst = arith.constant dense<0.000000e+00> : vector<4x256xf32>
    %23 = tpu.matmul %5, %22, %cst {dimension_numbers = #tpu.dot_dimension_numbers<[1], [0], [0], [1], [0, 0, 1, 1], [], []>} : vector<4x36xf32>, vector<36x256xf32>, vector<4x256xf32> -> vector<4x256xf32>
    %24 = vector.broadcast %6 : vector<4x1xf32> to vector<4x256xf32>
    %25 = arith.addf %23, %24 : vector<4x256xf32>
    %26 = arith.truncf %25 : vector<4x256xf32> to vector<4x256xbf16>
    %c0_8 = arith.constant 0 : index
    %c0_9 = arith.constant 0 : index
    %c0_10 = arith.constant 0 : index
    %27 = vector.load %arg5[%c0_8, %c0_9, %c0_10] : memref<1x4x256xbf16, #tpu.memory_space<vmem>>, vector<1x4x256xbf16>
    %28 = vector.shape_cast %27 : vector<1x4x256xbf16> to vector<4x256xbf16>
    %29 = vector.shape_cast %26 : vector<4x256xbf16> to vector<1x4x256xbf16>
    tpu.vector_store %arg5[%c0_8, %c0_9, %c0_10], %29 {strides = array<i32>} : memref<1x4x256xbf16, #tpu.memory_space<vmem>>, vector<1x4x256xbf16>,
    return
  }
  func.func @transform_0(%arg0: i32) -> (i32, i32, i32) {
    %c0_i32 = arith.constant 0 : i32
    %c0_i32_0 = arith.constant 0 : i32
    %c0_i32_1 = arith.constant 0 : i32
    return %arg0, %c0_i32, %c0_i32_0 : i32, i32, i32
  }
  func.func @transform_1(%arg0: i32) -> (i32, i32) {
    %c0_i32 = arith.constant 0 : i32
    %c0_i32_0 = arith.constant 0 : i32
    %c0_i32_1 = arith.constant 0 : i32
    return %c0_i32, %c0_i32_0 : i32, i32
  }
  func.func @transform_2(%arg0: i32) -> (i32, i32) {
    %c0_i32 = arith.constant 0 : i32
    %c0_i32_0 = arith.constant 0 : i32
    %c0_i32_1 = arith.constant 0 : i32
    return %c0_i32, %c0_i32_0 : i32, i32
  }
  func.func @transform_3(%arg0: i32) -> (i32, i32) {
    %c0_i32 = arith.constant 0 : i32
    %c0_i32_0 = arith.constant 0 : i32
    %c0_i32_1 = arith.constant 0 : i32
    return %c0_i32, %c0_i32_0 : i32, i32
  }
  func.func @transform_4(%arg0: i32) -> (i32, i32, i32) {
    %c0_i32 = arith.constant 0 : i32
    %c0_i32_0 = arith.constant 0 : i32
    %c0_i32_1 = arith.constant 0 : i32
    return %arg0, %c0_i32, %c0_i32_0 : i32, i32, i32
  }
}

</mosaic_0001>

<bundles_post_ra>
// kernel: reparam_conv_block.1
= control target key start
LH: loop header
LB: loop body
LE: loop exit
PB: predicated region body
PF: predicated region fallthrough
CT: control target
= control target key end

     0   :  { %s505_s15 = smov 0   ;;  %s569_s0 = inlined_call_operand.vmem [shape: f32[2,4,256], index: 0, kind: input, shape index: {}]   ;;  %s570_s1 = inlined_call_operand.vmem [shape: f32[4,36], index: 1, kind: input, shape index: {}]   ;;  %s571_s2 = inlined_call_operand.vmem [shape: f32[4,256], index: 2, kind: input, shape index: {}]   ;;  %s572_s3 = inlined_call_operand.vmem [shape: f32[4,1], index: 3, kind: input, shape index: {}]   ;;  %s573_s4 = inlined_call_operand.vmem [shape: bf16[2,4,256], index: 4, kind: output, shape index: {}]  }
   0x1 LB: > { %s436_s16 = sadd.s32 4294967295, %s473_s15   ;;  %p440_p0 = scmp.ge.s32.totalorder %s473_s15, 1  ;;  %s473_s15 = sphi %s505_s15, %s14_s15  }
   0x2   : > { %p162_p1 = scmp.lt.s32.totalorder %s473_s15, 3 }
   0x4   : > { %p163_p2 = pnand %p440_p0, %p162_p1 }
   0x5   : > { %p188_p3 = scmp.lt.s32.totalorder (!%p163_p2), %s436_s16, 1  ;;  %s475_s21 = smov (!%p163_p2), 16  }
   0x6   : > { %166 = sbr.rel (%p163_p2) target bundleno = 414 (0x19e), region = 36  ;;  %s476_s22 = smov (!%p163_p2), 112  }
   0x7   : > { %s477_s25 = smov (!%p163_p2), 127   ;;  %s478_s26 = smov (!%p163_p2), 1  }
   0xb   : > { %s575_s16 = smov (!%p188_p3, %s436_s16), 1  ;;  %v212_v5 = vlaneseq  ;;  %v522_v6 = vld [vmem:[%s571_s2] sm:$0xff]  ;;  %vm252_vm1 = vcmask 1043456   ;;  %v479_v42 = vmov 0   ;;  %vm322_vm5 = vcmask 293888  }
   0xc   : > { %s451_s17 = sshll.u32 %s575_s16, 3  ;;  %v218_v9 = vperm.slane %v522_v6, 0  ;;  %v219_v10 = vperm.slane %v522_v6, 4  ;;  %v238_v21 = vperm.slane %v522_v6, 1  ;;  %v239_v22 = vperm.slane %v522_v6, 5  ;;  %466 = vset.pattern.permute.xlu0 %v479_v42  ;;  %s452_s5 = sshll.u32 %s575_s16, 2 }
   0xd   : > { %s192_s20 = scalar_lea.vmem %s569_s0, %s451_s17  ;;  %v524_v8 = vand.u32 127, %v212_v5  ;;  %v200_v39 = vld [vmem:[%s572_s3] sm:$0xf]  ;;  %v291_v40 = vperm.slane %v522_v6, 3  ;;  %v292_v41 = vperm.slane %v522_v6, 7  ;;  %v268_v57 = vperm.slane %v522_v6, 2  ;;  %s197_s8 = scalar_lea.vmem %s573_s4, %s452_s5 }
   0xe   : > { %v201_v0 = vld [vmem:[%s192_s20] sm:$0xff]  ;;  %v222_v11 = vperm.slane %v218_v9, 0  ;;  %v223_v12 = vperm.slane %v219_v10, 0  ;;  %v242_v25 = vperm.slane %v238_v21, 1  ;;  %v243_v26 = vperm.slane %v239_v22, 1 }
   0xf   : > { %203 = vst [vmem:[#allocation1] ss:$2 sm:$0xff] %v201_v0  ;;  %vm214_vm0 = vcmp.lt.s32.totalorder %v524_v8, 16  ;;  %vm235_vm2 = vcmp.lt.s32.totalorder %v524_v8, 112  ;;  %vm286_vm3 = vcmp.lt.s32.totalorder %v524_v8, 127  ;;  %v295_v43 = vperm.slane %v291_v40, 3 }
  0x10   : > { %v296_v44 = vperm.slane %v292_v41, 3  ;;  %v269_v58 = vperm.slane %v522_v6, 6  ;;  %vm263_vm4 = vcmp.lt.s32.totalorder %v524_v8, 1  ;;  %v272_v59 = vperm.slane %v268_v57, 2  ;;  %v199_v10 = vld [vmem:[%s570_s1] sm:$0xf] }
  0x11   : > { %vm375_vm6 = vcmask 1041408  }
  0x12   : > { %v273_v60 = vperm.slane %v269_v58, 2 }
  0x16   : > { %v204_v1 = vld.sshfl [vmem:[#allocation1] sm:$0xff pattern:$0x75316420]  ;;  %v205_v2 = vld.sshfl [vmem:[#allocation1 + $0x8] sm:$0xff pattern:$0x75316420] }
  0x17   : > { %208 = vrot.lane.b32.xlu1 %v204_v1, %s475_s21  ;;  %226 = vst [vmem:[#allocation1] ss:$2 sm:$0xff] %v201_v0 }
  0x1e   : > { %v227_v3 = vld.sshfl [vmem:[#allocation1] sm:$0xff pattern:$0x75316420]  ;;  %v228_v4 = vld.sshfl [vmem:[#allocation1 + $0x8] sm:$0xff pattern:$0x75316420] }
  0x1f   : > { %210 = vrot.lane.b32.xlu1 %v205_v2, %s475_s21  ;;  %231 = vrot.lane.b32.xlu0 %v227_v3, %s476_s22  ;;  %247 = vst [vmem:[#allocation1 + $0x1] ss:$2 sm:$0xff] %v201_v0 }
  0x26   : > { %v249_v15 = vld.sshfl [vmem:[#allocation1 + $0x8] sm:$0xff pattern:$0x75316420]  ;;  %v248_v18 = vld.sshfl [vmem:[#allocation1] sm:$0xff pattern:$0x75316420] }
  0x27   : > { %233 = vrot.lane.b32.xlu0 %v228_v4, %s476_s22 }
  0x89   : > { %v209_v7 = vpop.permute.xlu1 %208 }
  0x91   : > { %v211_v13 = vpop.permute.xlu1 %210  ;;  %v232_v14 = vpop.permute.xlu0 %231 }
  0x92   : > { %v215_v16 = vsel %vm214_vm0, %v209_v7, %v211_v13  ;;  %v216_v17 = vsel %vm214_vm0, %v211_v13, %v209_v7 }
  0x93   : > { %v224_v19 = vmul.f32 %v222_v11, %v216_v17  ;;  %v225_v20 = vmul.f32 %v223_v12, %v215_v16 }
  0x95   : > { %v532_v23 = vsel %vm252_vm1, %v225_v20, %v249_v15  ;;  %v535_v24 = vsel %vm252_vm1, %v224_v19, %v248_v18 }
  0x96   : > { %282 = vrot.lane.b32.xlu1 %v532_v23, %s477_s25  ;;  %278 = vrot.lane.b32.xlu0 %v535_v24, %s477_s25  ;;  %v306_v32 = vrot.slane %v532_v23, 4  ;;  %v305_v33 = vrot.slane %v535_v24, 4 }
  0x99   : > { %v234_v27 = vpop.permute.xlu0 %233 }
  0x9a   : > { %v236_v28 = vsel %vm235_vm2, %v232_v14, %v234_v27  ;;  %v237_v29 = vsel %vm235_vm2, %v234_v27, %v232_v14 }
  0x9b   : > { %v244_v30 = vmul.f32 %v242_v25, %v236_v28  ;;  %v245_v31 = vmul.f32 %v243_v26, %v237_v29 }
  0x9d   : > { %280 = vrot.lane.b32.xlu2 %v244_v30, %s477_s25  ;;  %v307_v34 = vrot.slane %v244_v30, 4  ;;  %v309_v35 = vrot.slane %v245_v31, 4 }
  0x9e   : > { %255 = vrot.lane.b32.xlu1 %v535_v24, %s478_s26  ;;  %261 = vrot.lane.b32.xlu0 %v245_v31, %s478_s26 }
  0x9f   : > { %v308_v36 = vsel %vm252_vm1, %v305_v33, %v307_v34  ;;  %v310_v37 = vsel %vm252_vm1, %v306_v32, %v309_v35 }
  0xa5   : > { %284 = vrot.lane.b32.xlu2 %v245_v31, %s477_s25 }
  0xa6   : > { %319 = vperm.xlu0 %466, %v200_v39  }
  0xad   : > { %257 = vrot.lane.b32.xlu2 %v244_v30, %s478_s26 }
  0xb5   : > { %259 = vrot.lane.b32.xlu2 %v532_v23, %s478_s26 }
  0xf7   : > { %v281_v38 = vpop.permute.xlu2 %280 }
  0xff   : > { %v285_v45 = vpop.permute.xlu2 %284 }
 0x100   : > { %v288_v46 = vsel %vm286_vm3, %v281_v38, %v285_v45  ;;  %v290_v47 = vsel %vm286_vm3, %v285_v45, %v281_v38 }
 0x101   : > { %v299_v48 = vmul.f32 %v295_v43, %v288_v46  ;;  %v300_v49 = vmul.f32 %v296_v44, %v290_v47 }
 0x103   : > { %445 = vmatpush.msk.msra.mxu0 %vm252_vm1, %v299_v48  ;;  %447 = vmatpush.msk.msra.mxu1 %vm252_vm1, %v300_v49 }
 0x107   : > { %v258_v50 = vpop.permute.xlu2 %257 }
 0x108   : > { %v283_v51 = vpop.permute.xlu1 %282  ;;  %v279_v52 = vpop.permute.xlu0 %278 }
 0x109   : > { %v287_v53 = vsel %vm286_vm3, %v279_v52, %v283_v51  ;;  %v289_v54 = vsel %vm286_vm3, %v283_v51, %v279_v52 }
 0x10a   : > { %v297_v55 = vmul.f32 %v295_v43, %v287_v53  ;;  %v298_v56 = vmul.f32 %v296_v44, %v289_v54 }
 0x10c   : > { %344 = vmatpush.msra.mxu0 %v297_v55  ;;  %364 = vmatpush.msra.mxu1 %v298_v56 }
 0x10e   : > { %345 = vmatpush.msra.mxu0 %v308_v36  ;;  %365 = vmatpush.msra.mxu1 %v310_v37 }
 0x10f   : > { %v260_v61 = vpop.permute.xlu2 %259 }
 0x110   : > { %v256_v62 = vpop.permute.xlu1 %255  ;;  %v262_v63 = vpop.permute.xlu0 %261 }
 0x111   : > { %v265_v0 = vsel %vm263_vm4, %v258_v50, %v262_v63  ;;  %v267_v1 = vsel %vm263_vm4, %v262_v63, %v258_v50  ;;  %v264_v2 = vsel %vm263_vm4, %v256_v62, %v260_v61  ;;  %v266_v3 = vsel %vm263_vm4, %v260_v61, %v256_v62 }
 0x112   : > { %v276_v4 = vmul.f32 %v272_v59, %v267_v1  ;;  %v277_v5 = vmul.f32 %v273_v60, %v265_v0  ;;  %v274_v9 = vmul.f32 %v272_v59, %v266_v3  ;;  %v275_v8 = vmul.f32 %v273_v60, %v264_v2 }
 0x114   : > { %v315_v7 = vsel %vm252_vm1, %v276_v4, %v305_v33  ;;  %v316_v6 = vsel %vm252_vm1, %v277_v5, %v306_v32 }
 0x115   : > { %346 = vmatpush.msra.mxu0 %v315_v7  ;;  %366 = vmatpush.msra.mxu1 %v316_v6 }
 0x117   : > { %347 = vmatpush.msra.mxu0 %v274_v9  ;;  %367 = vmatpush.msra.mxu1 %v275_v8 }
 0x118   : > { %446 = vmatmul.msk.f32.vlgmr.msra.gmra.mxu0 %vm322_vm5, %v199_v10  ;;  %448 = vmatmul.msk.f32.vlgmr.msra.gmra.mxu1 %vm322_vm5, %v199_v10  ;;  %v320_v11 = vpop.permute.xlu0 %319 }
 0x195   : > { %v369_v12 = vpop.f32.mrf.mxu1  ;;  %v349_v13 = vpop.f32.mrf.mxu0 }
 0x196   : > { %v370_v14 = vadd.f32 %v369_v12, %v320_v11  ;;  %v350_v15 = vadd.f32 %v349_v13, %v320_v11 }
 0x198   : > { %v372_v16 = vpack.c.bf16 %v370_v14, %v350_v15 }
 0x19a   : > { %v374_v17 = vrot.slane %v372_v16, 2 }
 0x19c   : > { %v378_v18 = vsel %vm375_vm6, %v372_v16, %v374_v17 }
 0x19d   : > { %380 = vst [vmem:[%s197_s8] sm:$0xf] %v378_v18 }
 0x19e PF: > { %s14_s15 = sadd.s32 1, %s473_s15  }
 0x19f   : > { %p11_p4 = scmp.ge.s32.totalorder %s14_s15, 4  }
 0x1a1   :  { %13 = sbr.rel (!%p11_p4) target bundleno = 1 (0x1), region = 67 }

</bundles_post_ra>
